<compile_context>
chip_gen: v7x
topology: tpu7x:2x2x1
jax: 0.10.0
libtpu: 0.0.40
codegen_flags: <defaults>
</compile_context>

<pallas_src>
import jax
import jax.numpy as jnp
from jax import lax
from jax.experimental import pallas as pl
from jax.experimental.pallas import tpu as pltpu


def _make_kernel(s_tile: int, seq_len: int, hw: int, c_feat: int):
    # GAP (1/HW) and temporal mean (1/S) are both linear -> fuse into one scale.
    inv = 1.0 / float(seq_len * hw)

    def kernel(x_ref, w1t_ref, b1_ref, w2_ref, b2_ref, o_ref, acc_ref):
        # x_ref block: [1, S_TILE, C, HW] f32 (S_TILE frames of one batch elem).
        si = pl.program_id(1)

        @pl.when(si == 0)
        def _init():
            acc_ref[...] = jnp.zeros_like(acc_ref)

        w1t = w1t_ref[...]                                    # [C_feat, C] f32
        # Hoist the bias broadcast out of the frame loop (not CSE'd otherwise).
        b1b = jnp.broadcast_to(b1_ref[...], (c_feat, hw))     # [C_feat, HW] f32

        def frame_step(s, carry):
            xs = x_ref[0, s]                                  # [C, HW] f32, lane-dense
            # Backbone 1x1 conv for one frame: W1^T @ x_s  (K = C is tiny).
            h = jnp.dot(w1t, xs, preferred_element_type=jnp.float32)
            h = jnp.maximum(h + b1b, 0.0)                     # bias + ReLU
            # Reduce over HW immediately (XLU lane-reduction): only a
            # [C_feat, 1] value stays live, never the full activation map.
            return carry + jnp.sum(h, axis=-1, keepdims=True)

        partial = lax.fori_loop(0, s_tile, frame_step,
                                jnp.zeros((c_feat, 1), jnp.float32),
                                unroll=True)
        acc_ref[...] += partial                                # [C_feat, 1] f32

        @pl.when(si == pl.num_programs(1) - 1)
        def _finalize():
            # Row-form head: contract acc's leading dim against w2's leading dim
            # (== feat_row[1, C_feat] @ w2[C_feat, D]) -> lane-dense [1, D].
            proj = lax.dot_general(
                acc_ref[...], w2_ref[...],
                dimension_numbers=(((0,), (0,)), ((), ())),
                preferred_element_type=jnp.float32)            # [1, D]
            desc = proj * inv + b2_ref[...]                    # scale sum->mean, + bias
            o_ref[0] = desc.astype(o_ref.dtype)                # [1, D] row store

    return kernel


def sequence_late_fusion_forward(images, params, *, s_tile=None):
    """images: [B, S, C, H, W] float32 (NCHW frames). Returns dict with [B, D]."""
    B, S, C, H, W = images.shape
    HW = H * W
    w1, b1, w2, b2 = params
    C_feat = w1.shape[1]
    D = w2.shape[1]

    if s_tile is None:
        s_tile = 2 if S % 2 == 0 else 1      # a few inner grid steps per batch elem
    assert S % s_tile == 0, "sequence length must be divisible by the S tile"

    # Free reshape of the contiguous NCHW tensor; NO dtype cast here (a wrapper
    # cast would be an extra full HBM round trip). Kernel consumes f32 directly.
    x = images.reshape(B, S, C, HW)

    # Tiny weights: lay them out once at trace time for no-transpose MXU use.
    w1t = jnp.transpose(w1).astype(jnp.float32)          # [C_feat, C]
    b1c = b1.reshape(C_feat, 1).astype(jnp.float32)      # [C_feat, 1]
    w2c = w2.astype(jnp.float32)                         # [C_feat, D] (row-form head)
    b2c = b2.reshape(1, D).astype(jnp.float32)           # [1, D]

    out = pl.pallas_call(
        _make_kernel(s_tile, S, HW, C_feat),
        out_shape=jax.ShapeDtypeStruct((B, 1, D), jnp.float32),
        grid_spec=pltpu.PrefetchScalarGridSpec(
            num_scalar_prefetch=0,
            grid=(B, S // s_tile),                       # batch outer, S-tiles inner
            in_specs=[
                pl.BlockSpec((1, s_tile, C, HW), lambda b, si: (b, si, 0, 0)),
                pl.BlockSpec((C_feat, C), lambda b, si: (0, 0)),
                pl.BlockSpec((C_feat, 1), lambda b, si: (0, 0)),
                pl.BlockSpec((C_feat, D), lambda b, si: (0, 0)),
                pl.BlockSpec((1, D), lambda b, si: (0, 0)),
            ],
            out_specs=pl.BlockSpec((1, 1, D), lambda b, si: (b, 0, 0)),
            scratch_shapes=[pltpu.VMEM((C_feat, 1), jnp.float32)],
        ),
        compiler_params=pltpu.CompilerParams(
            # Batch is independent (megacore-shardable on v7x); the S axis
            # carries the accumulator and must stay "arbitrary".
            dimension_semantics=("parallel", "arbitrary")),
    )(x, w1t, b1c, w2c, b2c)

    return {"final_descriptor": out.reshape(B, D)}


def _reference(images, params):
    """Pure-JAX f32 reference mirroring the PyTorch forward semantics."""
    B, S, C, H, W = images.shape
    w1, b1, w2, b2 = params
    flat = images.reshape(B * S, C, H * W).transpose(0, 2, 1)            # [BS, HW, C]
    h = jnp.einsum("nhc,cf->nhf", flat, w1,
                   precision=jax.lax.Precision.HIGHEST) + b1             # backbone
    h = jnp.maximum(h, 0.0)
    feat = h.mean(axis=1)                                                # head: GAP
    desc = jnp.dot(feat, w2, precision=jax.lax.Precision.HIGHEST) + b2   # head: proj
    desc = desc.reshape(B, S, -1)                                        # [B, S, D]
    return desc.mean(axis=1)                                             # temporal avg


if __name__ == "__main__":
    B, S, C, H, W = 2, 8, 4, 16, 16
    C_feat, D = 32, 64

    key = jax.random.PRNGKey(0)
    k_x, k_w1, k_b1, k_w2, k_b2 = jax.random.split(key, 5)

    images = jax.random.normal(k_x, (B, S, C, H, W), dtype=jnp.float32)
    w1 = jax.random.normal(k_w1, (C, C_feat), dtype=jnp.float32) * 0.1
    b1 = jax.random.normal(k_b1, (C_feat,), dtype=jnp.float32) * 0.1
    w2 = jax.random.normal(k_w2, (C_feat, D), dtype=jnp.float32) * 0.1
    b2 = jax.random.normal(k_b2, (D,), dtype=jnp.float32) * 0.1
    params = (w1, b1, w2, b2)

    out = sequence_late_fusion_forward(images, params)
    desc = jax.block_until_ready(out["final_descriptor"])

    ref = _reference(images, params)

    assert desc.shape == (B, D)
    # Kernel is f32 end-to-end now; tolerance only covers MXU f32-pass /
    # accumulation-order differences vs the HIGHEST-precision XLA reference.
    assert jnp.allclose(desc, ref, atol=5e-3, rtol=5e-3), "mismatch vs fp32 reference"
    print("KERNEL_OK")
</pallas_src>

<mosaic_0001>
module attributes {stable_mosaic.version = 11 : i64} {
  func.func @kernel(%arg0: i32, %arg1: i32, %arg2: memref<1x2x4x256xf32, #tpu.memory_space<vmem>>, %arg3: memref<32x4xf32, #tpu.memory_space<vmem>>, %arg4: memref<32x1xf32, #tpu.memory_space<vmem>>, %arg5: memref<32x64xf32, #tpu.memory_space<vmem>>, %arg6: memref<1x64xf32, #tpu.memory_space<vmem>>, %arg7: memref<1x1x64xf32, #tpu.memory_space<vmem>>, %arg8: memref<32x1xf32, #tpu.memory_space<vmem>>) attributes {dimension_semantics = [#tpu.dimension_semantics<parallel>, #tpu.dimension_semantics<arbitrary>], iteration_bounds = array<i64: 2, 4>, scalar_prefetch = 0 : i64, scratch_operands = 1 : i64, tpu.core_type = #tpu.core_type<tc>, window_params = [{transform_indices = @transform_0, window_bounds = array<i64: 1, 2, 4, 256>}, {pipeline_mode = #tpu.pipeline_mode<synchronous>, transform_indices = @transform_1, window_bounds = array<i64: 32, 4>}, {pipeline_mode = #tpu.pipeline_mode<synchronous>, transform_indices = @transform_2, window_bounds = array<i64: 32, 1>}, {pipeline_mode = #tpu.pipeline_mode<synchronous>, transform_indices = @transform_3, window_bounds = array<i64: 32, 64>}, {pipeline_mode = #tpu.pipeline_mode<synchronous>, transform_indices = @transform_4, window_bounds = array<i64: 1, 64>}, {transform_indices = @transform_5, window_bounds = array<i64: 1, 1, 64>}]} {
    %c0_i32 = arith.constant 0 : i32
    %0 = arith.cmpi eq, %arg1, %c0_i32 : i32
    %1 = arith.extui %0 : i1 to i32
    %c0_i32_0 = arith.constant 0 : i32
    %2 = arith.cmpi ne, %1, %c0_i32_0 : i32
    scf.if %2 {
      %cst_22 = arith.constant 0.000000e+00 : f32
      %34 = vector.broadcast %cst_22 : f32 to vector<32x1xf32>
      %c0_23 = arith.constant 0 : index
      %c0_24 = arith.constant 0 : index
      %35 = vector.load %arg8[%c0_23, %c0_24] : memref<32x1xf32, #tpu.memory_space<vmem>>, vector<32x1xf32>
      tpu.vector_store %arg8[%c0_23, %c0_24], %34 {strides = array<i32>} : memref<32x1xf32, #tpu.memory_space<vmem>>, vector<32x1xf32>,
    } else {
    }
    %c0 = arith.constant 0 : index
    %c0_1 = arith.constant 0 : index
    %3 = vector.load %arg3[%c0, %c0_1] : memref<32x4xf32, #tpu.memory_space<vmem>>, vector<32x4xf32>
    %c0_2 = arith.constant 0 : index
    %c0_3 = arith.constant 0 : index
    %4 = vector.load %arg4[%c0_2, %c0_3] : memref<32x1xf32, #tpu.memory_space<vmem>>, vector<32x1xf32>
    %5 = vector.shape_cast %4 : vector<32x1xf32> to vector<32x1xf32>
    %6 = vector.broadcast %5 : vector<32x1xf32> to vector<32x256xf32>
    %cst = arith.constant 0.000000e+00 : f32
    %7 = vector.broadcast %cst : f32 to vector<32x1xf32>
    %c0_i32_4 = arith.constant 0 : i32
    %c0_5 = arith.constant 0 : index
    %8 = arith.index_cast %c0_i32_4 : i32 to index
    %c0_6 = arith.constant 0 : index
    %c0_7 = arith.constant 0 : index
    %9 = vector.load %arg2[%c0_5, %8, %c0_6, %c0_7] : memref<1x2x4x256xf32, #tpu.memory_space<vmem>>, vector<1x1x4x256xf32>
    %10 = vector.shape_cast %9 : vector<1x1x4x256xf32> to vector<4x256xf32>
    %cst_8 = arith.constant dense<0.000000e+00> : vector<32x256xf32>
    %11 = tpu.matmul %3, %10, %cst_8 {dimension_numbers = #tpu.dot_dimension_numbers<[1], [0], [0], [1], [0, 0, 1, 1], [], []>} : vector<32x4xf32>, vector<4x256xf32>, vector<32x256xf32> -> vector<32x256xf32>
    %12 = arith.addf %11, %6 : vector<32x256xf32>
    %cst_9 = arith.constant 0.000000e+00 : f32
    %13 = vector.broadcast %cst_9 : f32 to vector<32x256xf32>
    %14 = arith.maximumf %12, %13 : vector<32x256xf32>
    %cst_10 = arith.constant dense<0.000000e+00> : vector<32xf32>
    %15 = vector.multi_reduction <add>, %14, %cst_10 [1] : vector<32x256xf32> to vector<32xf32>
    %16 = vector.shape_cast %15 : vector<32xf32> to vector<32x1xf32>
    %17 = arith.addf %7, %16 : vector<32x1xf32>
    %c1_i32 = arith.constant 1 : i32
    %c0_11 = arith.constant 0 : index
    %18 = arith.index_cast %c1_i32 : i32 to index
    %c0_12 = arith.constant 0 : index
    %c0_13 = arith.constant 0 : index
    %19 = vector.load %arg2[%c0_11, %18, %c0_12, %c0_13] : memref<1x2x4x256xf32, #tpu.memory_space<vmem>>, vector<1x1x4x256xf32>
    %20 = vector.shape_cast %19 : vector<1x1x4x256xf32> to vector<4x256xf32>
    %cst_14 = arith.constant dense<0.000000e+00> : vector<32x256xf32>
    %21 = tpu.matmul %3, %20, %cst_14 {dimension_numbers = #tpu.dot_dimension_numbers<[1], [0], [0], [1], [0, 0, 1, 1], [], []>} : vector<32x4xf32>, vector<4x256xf32>, vector<32x256xf32> -> vector<32x256xf32>
    %22 = arith.addf %21, %6 : vector<32x256xf32>
    %cst_15 = arith.constant 0.000000e+00 : f32
    %23 = vector.broadcast %cst_15 : f32 to vector<32x256xf32>
    %24 = arith.maximumf %22, %23 : vector<32x256xf32>
    %cst_16 = arith.constant dense<0.000000e+00> : vector<32xf32>
    %25 = vector.multi_reduction <add>, %24, %cst_16 [1] : vector<32x256xf32> to vector<32xf32>
    %26 = vector.shape_cast %25 : vector<32xf32> to vector<32x1xf32>
    %27 = arith.addf %17, %26 : vector<32x1xf32>
    %c2_i32 = arith.constant 2 : i32
    %c0_17 = arith.constant 0 : index
    %c0_18 = arith.constant 0 : index
    %28 = vector.load %arg8[%c0_17, %c0_18] : memref<32x1xf32, #tpu.memory_space<vmem>>, vector<32x1xf32>
    %29 = arith.addf %28, %27 : vector<32x1xf32>
    %c0_19 = arith.constant 0 : index
    %c0_20 = arith.constant 0 : index
    %30 = vector.load %arg8[%c0_19, %c0_20] : memref<32x1xf32, #tpu.memory_space<vmem>>, vector<32x1xf32>
    tpu.vector_store %arg8[%c0_19, %c0_20], %29 {strides = array<i32>} : memref<32x1xf32, #tpu.memory_space<vmem>>, vector<32x1xf32>,
    %c3_i32 = arith.constant 3 : i32
    %31 = arith.cmpi eq, %arg1, %c3_i32 : i32
    %32 = arith.extui %31 : i1 to i32
    %c0_i32_21 = arith.constant 0 : i32
    %33 = arith.cmpi ne, %32, %c0_i32_21 : i32
    scf.if %33 {
      %c0_22 = arith.constant 0 : index
      %c0_23 = arith.constant 0 : index
      %34 = vector.load %arg8[%c0_22, %c0_23] : memref<32x1xf32, #tpu.memory_space<vmem>>, vector<32x1xf32>
      %c0_24 = arith.constant 0 : index
      %c0_25 = arith.constant 0 : index
      %35 = vector.load %arg5[%c0_24, %c0_25] : memref<32x64xf32, #tpu.memory_space<vmem>>, vector<32x64xf32>
      %cst_26 = arith.constant dense<0.000000e+00> : vector<1x64xf32>
      %36 = tpu.matmul %34, %35, %cst_26 {dimension_numbers = #tpu.dot_dimension_numbers<[0], [0], [1], [1], [0, 1, 1, 1], [], []>} : vector<32x1xf32>, vector<32x64xf32>, vector<1x64xf32> -> vector<1x64xf32>
      %cst_27 = arith.constant 4.8828125E-4 : f32
      %37 = vector.broadcast %cst_27 : f32 to vector<1x64xf32>
      %38 = arith.mulf %36, %37 : vector<1x64xf32>
      %c0_28 = arith.constant 0 : index
      %c0_29 = arith.constant 0 : index
      %39 = vector.load %arg6[%c0_28, %c0_29] : memref<1x64xf32, #tpu.memory_space<vmem>>, vector<1x64xf32>
      %40 = arith.addf %38, %39 : vector<1x64xf32>
      %c0_30 = arith.constant 0 : index
      %c0_31 = arith.constant 0 : index
      %c0_32 = arith.constant 0 : index
      %41 = vector.load %arg7[%c0_30, %c0_31, %c0_32] : memref<1x1x64xf32, #tpu.memory_space<vmem>>, vector<1x1x64xf32>
      %42 = vector.shape_cast %41 : vector<1x1x64xf32> to vector<1x64xf32>
      %43 = vector.shape_cast %40 : vector<1x64xf32> to vector<1x1x64xf32>
      tpu.vector_store %arg7[%c0_30, %c0_31, %c0_32], %43 {strides = array<i32>} : memref<1x1x64xf32, #tpu.memory_space<vmem>>, vector<1x1x64xf32>,
    } else {
    }
    return
  }
  func.func @transform_0(%arg0: i32, %arg1: i32) -> (i32, i32, i32, i32) {
    %c0_i32 = arith.constant 0 : i32
    %c0_i32_0 = arith.constant 0 : i32
    %c0_i32_1 = arith.constant 0 : i32
    return %arg0, %arg1, %c0_i32, %c0_i32_0 : i32, i32, i32, i32
  }
  func.func @transform_1(%arg0: i32, %arg1: i32) -> (i32, i32) {
    %c0_i32 = arith.constant 0 : i32
    %c0_i32_0 = arith.constant 0 : i32
    %c0_i32_1 = arith.constant 0 : i32
    return %c0_i32, %c0_i32_0 : i32, i32
  }
  func.func @transform_2(%arg0: i32, %arg1: i32) -> (i32, i32) {
    %c0_i32 = arith.constant 0 : i32
    %c0_i32_0 = arith.constant 0 : i32
    %c0_i32_1 = arith.constant 0 : i32
    return %c0_i32, %c0_i32_0 : i32, i32
  }
  func.func @transform_3(%arg0: i32, %arg1: i32) -> (i32, i32) {
    %c0_i32 = arith.constant 0 : i32
    %c0_i32_0 = arith.constant 0 : i32
    %c0_i32_1 = arith.constant 0 : i32
    return %c0_i32, %c0_i32_0 : i32, i32
  }
  func.func @transform_4(%arg0: i32, %arg1: i32) -> (i32, i32) {
    %c0_i32 = arith.constant 0 : i32
    %c0_i32_0 = arith.constant 0 : i32
    %c0_i32_1 = arith.constant 0 : i32
    return %c0_i32, %c0_i32_0 : i32, i32
  }
  func.func @transform_5(%arg0: i32, %arg1: i32) -> (i32, i32, i32) {
    %c0_i32 = arith.constant 0 : i32
    %c0_i32_0 = arith.constant 0 : i32
    %c0_i32_1 = arith.constant 0 : i32
    return %arg0, %c0_i32, %c0_i32_0 : i32, i32, i32
  }
}

</mosaic_0001>

<bundles_post_ra>
// kernel: tpu_custom_call.1
= control target key start
LH: loop header
LB: loop body
LE: loop exit
PB: predicated region body
PF: predicated region fallthrough
CT: control target
= control target key end

     0   :  { %s1414_s0 = inlined_call_operand.hbm [shape: f32[2,8,4,256], index: 0, kind: input, shape index: {}]   ;;  %s1415_s1 = inlined_call_operand.vmem [shape: f32[32,4], index: 1, kind: input, shape index: {}]   ;;  %s1416_s2 = inlined_call_operand.vmem [shape: f32[32,1], index: 2, kind: input, shape index: {}]   ;;  %s1417_s3 = inlined_call_operand.vmem [shape: f32[32,64], index: 3, kind: input, shape index: {}]   ;;  %s1418_s4 = inlined_call_operand.vmem [shape: f32[1,64], index: 4, kind: input, shape index: {}]   ;;  %s1419_s5 = inlined_call_operand.hbm [shape: f32[2,1,64], index: 5, kind: output, shape index: {}]  }
   0x1   :  { %1425 = sst [smem:[#allocation13_spill]] %s1419_s5 }
   0x2   :  { %10 = vsyncpa [#allocation4], 0 }
   0x3   :  { %12 = vsyncpa [#allocation4 + $0x1], 0 }
   0x4   :  { %13 = vsyncpa [#allocation5], 0 }
   0x5   :  { %15 = vsyncpa [#allocation5 + $0x1], 0  ;;  %s1142_s18 = smov 0   ;;  %s1144_s19 = smov 0  }
   0x6   :  { %s1146_s20 = smov 0   ;;  %s1148_s21 = smov 0  }
   0x7   :  { %s1150_s22 = smov 0   ;;  %s1152_s23 = smov 0  }
   0x8   :  { %s1154_s24 = smov 0   ;;  %s1156_s25 = smov 0  }
   0x9   :  { %s1158_s26 = smov 0   ;;  %s1160_s27 = smov 0  }
   0xa   :  { %s1162_s28 = smov 0  }
   0xb LB: > { %1426 = sst [smem:[#allocation9_spill]] %s1080_s23  ;;  %s781_s29 = sadd.s32 4294967295, %s1100_s28   ;;  %s1100_s28 = sphi %s1162_s28, %s21_s28   ;;  %s1096_s27 = sphi %s1160_s27, %s1450_s27   ;;  %s1092_s26 = sphi %s1158_s26, %s1449_s26   ;;  %s1088_s25 = sphi %s1156_s25, %s1448_s25   ;;  %s1084_s24 = sphi %s1154_s24, %s1447_s24   ;;  %s1080_s23 = sphi %s1152_s23, %s1439_s23   ;;  %s1076_s22 = sphi %s1150_s22, %s1446_s22   ;;  %s1072_s21 = sphi %s1148_s21, %s1445_s21   ;;  %s1068_s20 = sphi %s1146_s20, %s1444_s20   ;;  %s1064_s19 = sphi %s1144_s19, %s1443_s19   ;;  %s1060_s18 = sphi %s1142_s18, %s1442_s18  }
   0xc   : > { %s782_s30 = sadd.s32 4294967294, %s1100_s28   ;;  %s30_s6 = sadd.s32 1, %s1092_s26 }
   0xd   : > { %s33_s7 = sadd.s32 1, %s1096_s27  ;;  %p31_p0 = scmp.ge.s32.totalorder %s30_s6, 4 }
   0xe   : > { %s42_s8 = sadd.s32 1, %s1080_s23  ;;  %p49_p1 = scmp.ne.s32.totalorder %s1080_s23, %s1076_s22 }
   0xf   : > { %p50_p2 = scmp.eq.s32.totalorder %s1100_s28, 0  ;;  %s1452_s6 = smov (%p31_p0, %s30_s6), 0 }
  0x10   : > { %1427 = sst [smem:[#allocation10_spill]] %s1452_s6  ;;  %s1454_s7 = smov (!%p31_p0, %s33_s7), %s1096_s27 }
  0x11   : > { %s38_s9 = ssub.s32 %s1092_s26, %s1452_s6  ;;  %p1208_p3 = por %p50_p2, %p49_p1 }
  0x12   : > { %p35_p4 = scmp.ge.s32.totalorder %s1454_s7, 2  ;;  %p55_p5 = scmp.ne.s32.totalorder %s1076_s22, %s1072_s21 }
  0x13   : > { %p56_p6 = scmp.eq.s32.totalorder %s781_s29, 0  ;;  %s152_s11 = sadd.s32 1, %s1068_s20 }
  0x14   : > { %s1456_s7 = smov (%p35_p4, %s1454_s7), 0  ;;  %p162_p8 = scmp.ne.s32.totalorder %s1068_s20, %s1064_s19 }
  0x15   : > { %1429 = sst [smem:[#allocation11_spill]] %s1456_s7  ;;  %p1216_p7 = por %p56_p6, %p55_p5 }
  0x16   : > { %s37_s13 = ssub.s32 %s1096_s27, %s1456_s7  ;;  %p163_p9 = scmp.eq.s32.totalorder %s781_s29, 7 }
  0x17   : > { %s39_s14 = sor.u32 %s38_s9, %s37_s13  ;;  %p150_p10 = scmp.eq.s32.totalorder %s37_s13, 0 }
  0x18   : > { %p40_p11 = scmp.eq.s32.totalorder %s39_s14, 0  ;;  %p1224_p12 = por %p163_p9, %p162_p8 }
  0x19   : > { %s1229_s16 = scalar_select %p150_p10, %s1068_s20, %s152_s11  }
  0x1a   : > { %s1431_s15 = scalar_select %p1224_p12, 1, 0 }
  0x1b   : > { %s1232_s17 = scalar_select %p40_p11, %s1080_s23, %s42_s8  }
  0x1c   : > { %p168_p13 = scmp.ne.s32.totalorder %s1064_s19, %s1060_s18  ;;  %p169_p0 = scmp.eq.s32.totalorder %s782_s30, 7 }
  0x1d   : > { %1432 = sst [smem:[#allocation12_spill]] %s1232_s17  ;;  %p846_p1 = scmp.lt.s32.totalorder %s1100_s28, 8 }
  0x1e   : > { %p1237_p2 = por %p169_p0, %p168_p13  ;;  %s201_s29 = sand.u32 1, %s1080_s23  }
  0x1f   : > { %s785_s9 = sshll.u32 %s201_s29, 4  ;;  %s811_s13 = sshll.u32 %s1092_s26, 2 }
  0x20   : > { %s1433_s21 = scalar_select %p1237_p2, 1, 0 }
  0x21   : > { %s788_s14 = sshll.u32 %s1096_s27, 4  ;;  %s205_s7 = scalar_lea.vmem [#allocation3], %s785_s9 }
  0x22   : > { %s215_s6 = sshll.u32 %s205_s7, 4  ;;  %s212_s5 = sadd.s32 %s811_s13, %s788_s14  ;;  %s1244_s6 = int_to_ptr.vmem [resolvable:$true] %s215_s6 }
  0x23   : > { %s789_s11 = sshll.u32 %s212_s5, 6  ;;  %p1248_p4 = pnand %p846_p1, %p1208_p3 }
  0x24   : > { %s1255_s23 = scalar_lea.hbm %s1414_s0, %s789_s11  ;;  %s1257_s7 = scalar_lea.sflag [#allocation4], %s201_s29 }
  0x25   : > { %s948_s9 = scalar_lea.hbm %s1255_s23, 256  ;;  %p950_p3 = pneg %p1248_p4 }
  0x26   : > { %p949_p5 = scmp.ne.s32.totalorder %s1255_s23, %s948_s9  ;;  %s953_s17 = scalar_lea.hbm %s1414_s0, 2048 }
  0x27   : > { %p954_p9 = scmp.lt.u32.totalorder %s1255_s23, %s1414_s0  ;;  %p955_p10 = scmp.lt.u32.totalorder %s953_s17, %s948_s9 }
  0x28   : > { %p951_p6 = pnand %p950_p3, %p949_p5  ;;  %p957_p13 = scmp.lt.u32.totalorder %s948_s9, %s1255_s23 }
  0x29   : > { %p956_p11 = por %p955_p10, %p954_p9 }
  0x2a   : > { %p952_p8 = pneg %p951_p6 }
  0x2b   : > { %p958_p0 = por %p957_p13, %p956_p11 }
  0x2d   : > { %p959_p1 = pnand %p958_p0, %p952_p8 }
  0x2f   : > { %962 = shalt.err (!%p959_p1)
}
  0x30   : > { %s963_s29 = scalar_lea.vmem %s1244_s6, 256  ;;  %s1102_s11 = smov [#allocation3]  }
  0x31   : > { %p964_p5 = scmp.ne.s32.totalorder %s1244_s6, %s963_s29  ;;  %s968_s30 = sshll.u32 %s1102_s11, 4  ;;  %s969_s30 = int_to_ptr.vmem [resolvable:$false] %s968_s30 }
  0x32   : > { %s970_s5 = scalar_lea.vmem %s969_s30, 512  ;;  %p971_p12 = scmp.lt.s32.totalorder %s1244_s6, %s969_s30 }
  0x33   : > { %p966_p6 = pnand %p964_p5, %p950_p3  ;;  %p972_p9 = scmp.lt.s32.totalorder %s970_s5, %s963_s29 }
  0x35   : > { %p967_p2 = pneg %p966_p6  ;;  %p973_p10 = por %p972_p9, %p971_p12 }
  0x37   : > { %p974_p11 = pnand %p973_p10, %p967_p2 }
  0x39   : > { %977 = shalt.err (!%p974_p11)
}
  0x3a   : > { %s1103_s9 = smov 128   ;;  %s1104_s10 = smov 8  }
  0x3b   : > { %841 = dma.hbm_to_vmem [thread:$0]  (!%p1248_p4), %s1255_s23, 256, %s1244_s6, %s1257_s7, %s1103_s9, %s1103_s9, %s1104_s10  }
  0x3c   : > { %p790_p3 = scmp.ge.s32.totalorder %s1100_s28, 1  ;;  %p223_p8 = scmp.lt.s32.totalorder %s1100_s28, 9 }
  0x3e   : > { %p224_p13 = pnand %p790_p3, %p223_p8 }
  0x3f   : > { %s229_s17 = sand.u32 (!%p224_p13), 1, %s1076_s22  }
  0x40   : > { %227 = sbr.rel (%p224_p13) target bundleno = 835 (0x343), region = 40  ;;  %s791_s13 = sshll.u32 (!%p224_p13), %s229_s17, 4 }
  0x41   : > { %s230_s14 = scalar_lea.sflag (!%p224_p13), [#allocation4], %s229_s17  ;;  %s233_s29 = scalar_lea.vmem (!%p224_p13), [#allocation3], %s791_s13 }
  0x47   : > { %1051 = dma.done.wait (%p1216_p7), %s230_s14, 256  }
  0x48   : > { %1053 = vsyncadd (%p1216_p7), %s230_s14, 4294967040  ;;  %s257_s11 = sand.u32 1, %s1064_s19   ;;  %p792_p12 = scmp.ne.s32.totalorder %s1084_s24, 0 }
  0x49   : > { %s1295_s23 = scalar_lea.vmem [#allocation6], %s257_s11  ;;  %vm264_vm0 = vcmask (!%p792_p12), 7168   ;;  %v1105_v0 = vmov (!%p792_p12), 0.0  }
  0x4a   : > { %263 = sbr.rel (%p792_p12) target bundleno = 81 (0x51), region = 48  ;;  %265 = vst.msk [vmem:[#allocation2] sm:$0xff] (!%p792_p12), %vm264_vm0, %v1105_v0  ;;  %266 = vst.msk [vmem:[#allocation2 + $0x8] sm:$0xff] (!%p792_p12), %vm264_vm0, %v1105_v0 }
  0x4b   : > { %267 = vst.msk [vmem:[#allocation2 + $0x10] sm:$0xff] (!%p792_p12), %vm264_vm0, %v1105_v0  ;;  %268 = vst.msk [vmem:[#allocation2 + $0x18] sm:$0xff] (!%p792_p12), %vm264_vm0, %v1105_v0 }
  0x51 PF: > { %v297_v1 = vld [vmem:[%s233_s29] sm:$0xff]  ;;  %vm313_vm1 = vcmask 1043456   ;;  %v799_v2 = vld [vmem:[%s233_s29 + $0x8] sm:$0xff]  ;;  %v1106_v5 = vmov 0.0   ;;  %vm300_vm2 = vcmask 31744   ;;  %v1107_v7 = vmov 0  }
  0x52   : > { %v299_v3 = vcombine.high %v297_v1, %v297_v1  ;;  %v434_v4 = vcombine.high %v799_v2, %v799_v2  ;;  %382 = vmatprep.mubr.f32.mxu0 %v1106_v5  ;;  %503 = vmatprep.mubr.f32.mxu1 %v1106_v5  ;;  %v269_v6 = vld [vmem:[%s1415_s1] sm:$0xff]  ;;  %v275_v9 = vld [vmem:[%s1416_s2 + $0x10] sm:$0xff]  ;;  %v270_v10 = vld [vmem:[%s1415_s1 + $0x8] sm:$0xff]  ;;  %vm560_vm3 = vcmask 7168   ;;  %p806_p7 = scmp.ne.s32.totalorder %s1084_s24, 3 }
  0x53   : > { %944 = vset.pattern.permute.xlu0 %v1107_v7  ;;  %945 = vset.pattern.permute.xlu1 %v1107_v7  ;;  %v273_v8 = vld [vmem:[%s1416_s2] sm:$0xff]  ;;  %v274_v11 = vld [vmem:[%s1416_s2 + $0x8] sm:$0xff]  ;;  %v276_v12 = vld [vmem:[%s1416_s2 + $0x18] sm:$0xff]  ;;  %vm1109_vm4 = vmmov (!%p806_p7), 0   ;;  %vm609_vm5 = vcmask (!%p806_p7), 261120   ;;  %vm686_vm6 = vcmask (!%p806_p7), 516096  }
  0x54   : > { %793 = vmatprep.subr.msk.mxu0 %vm313_vm1, %v299_v3  ;;  %800 = vmatprep.subr.msk.mxu1 %vm313_vm1, %v434_v4  ;;  %v271_v13 = vld [vmem:[%s1415_s1 + $0x10] sm:$0xff]  ;;  %v272_v14 = vld [vmem:[%s1415_s1 + $0x18] sm:$0xff] }
  0x55   : > { %794 = vmatpush1.msk.msra.mxu0 %vm313_vm1, %v297_v1  ;;  %801 = vmatpush1.msk.msra.mxu1 %vm313_vm1, %v799_v2 }
  0x56   : > { %795 = vmatmul.mubr.msk.f32.vlgmr.msra.gmra.mrb[0].mxu0 %vm300_vm2, %v269_v6  ;;  %802 = vmatmul.mubr.msk.f32.vlgmr.msra.gmra.mrb[0].mxu1 %vm300_vm2, %v269_v6 }
  0x57   : > { %388 = vmatprep.mubr.f32.mxu0 %v1106_v5  ;;  %509 = vmatprep.mubr.f32.mxu1 %v1106_v5 }
  0x58   : > { %279 = vperm.xlu0 %944, %v273_v8   ;;  %289 = vperm.xlu1 %945, %v275_v9  }
  0x5a   : > { %796 = vmatmul.mubr.msk.f32.gmra.mrb[2].mxu0 %vm300_vm2, %v270_v10  ;;  %803 = vmatmul.mubr.msk.f32.gmra.mrb[2].mxu1 %vm300_vm2, %v270_v10 }
  0x5b   : > { %394 = vmatprep.mubr.f32.mxu0 %v1106_v5  ;;  %515 = vmatprep.mubr.f32.mxu1 %v1106_v5 }
  0x5c   : > { %284 = vperm.xlu0 %944, %v274_v11   ;;  %294 = vperm.xlu1 %945, %v276_v12   ;;  %v552_v12 = vld [vmem:[#allocation2] sm:$0xff] }
  0x5e   : > { %797 = vmatmul.mubr.msk.f32.gmra.mrb[4].mxu0 %vm300_vm2, %v271_v13  ;;  %804 = vmatmul.mubr.msk.f32.gmra.mrb[4].mxu1 %vm300_vm2, %v271_v13 }
  0x5f   : > { %400 = vmatprep.mubr.f32.mxu0 %v1106_v5  ;;  %521 = vmatprep.mubr.f32.mxu1 %v1106_v5 }
  0x62   : > { %798 = vmatmul.mubr.msk.f32.gmra.mrb[6].mxu0 %vm300_vm2, %v272_v14  ;;  %805 = vmatmul.mubr.msk.f32.gmra.mrb[6].mxu1 %vm300_vm2, %v272_v14 }
  0xd7   : > { %v280_v15 = vpop.permute.xlu0 %279  ;;  %v290_v27 = vpop.permute.xlu1 %289 }
  0xdb   : > { %v285_v26 = vpop.permute.xlu0 %284  ;;  %v295_v56 = vpop.permute.xlu1 %294 }
 0x129   : > { %v384_v16 = vpop.f32.mrb[0].mxu0  ;;  %v505_v17 = vpop.f32.mrb[0].mxu1 }
 0x12a   : > { %v385_v18 = vadd.f32 %v384_v16, %v280_v15  ;;  %v506_v19 = vadd.f32 %v505_v17, %v280_v15  ;;  %v386_v20 = vpop.f32.mrb[1].mxu0  ;;  %v507_v21 = vpop.f32.mrb[1].mxu1  ;;  %v553_v17 = vld [vmem:[#allocation2 + $0x8] sm:$0xff] }
 0x12b   : > { %v387_v22 = vadd.f32 %v386_v20, %v280_v15  ;;  %v508_v23 = vadd.f32 %v507_v21, %v280_v15 }
 0x12c   : > { %v407_v24 = vmax.f32 %v385_v18, 0.0  ;;  %v528_v25 = vmax.f32 %v506_v19, 0.0 }
 0x12d   : > { %v408_v28 = vmax.f32 %v387_v22, 0.0  ;;  %v529_v29 = vmax.f32 %v508_v23, 0.0  ;;  %v390_v30 = vpop.f32.mrb[2].mxu0  ;;  %v511_v31 = vpop.f32.mrb[2].mxu1  ;;  %v554_v22 = vld [vmem:[#allocation2 + $0x10] sm:$0xff] }
 0x12e   : > { %v391_v32 = vadd.f32 %v390_v30, %v285_v26  ;;  %v512_v33 = vadd.f32 %v511_v31, %v285_v26  ;;  %v392_v34 = vpop.f32.mrb[3].mxu0  ;;  %v513_v35 = vpop.f32.mrb[3].mxu1 }
 0x12f   : > { %v393_v36 = vadd.f32 %v392_v34, %v285_v26  ;;  %v514_v37 = vadd.f32 %v513_v35, %v285_v26  ;;  %v536_v38 = vadd.f32 %v529_v29, %v528_v25  ;;  %v415_v39 = vadd.f32 %v408_v28, %v407_v24  ;;  %v574_v34 = vld [vmem:[%s1417_s3 + $0x8] sm:$0xff] (!%p806_p7) }
 0x130   : > { %v409_v40 = vmax.f32 %v391_v32, 0.0  ;;  %v530_v41 = vmax.f32 %v512_v33, 0.0  ;;  %v1108_v32 = vmov (!%p806_p7), 0.0|0.0   ;;  %v573_v33 = vld [vmem:[%s1417_s3] sm:$0xff] (!%p806_p7) }
 0x131   : > { %v410_v42 = vmax.f32 %v393_v36, 0.0  ;;  %v531_v43 = vmax.f32 %v514_v37, 0.0  ;;  %v517_v44 = vpop.f32.mrb[4].mxu1  ;;  %537 = vadd.xlane.f32.xlu1 %v536_v38  ;;  %v396_v45 = vpop.f32.mrb[4].mxu0  ;;  %416 = vadd.xlane.f32.xlu0 %v415_v39  ;;  %v829_v36 = vpack.c.bf16 (!%p806_p7), %v574_v34, %v573_v33  ;;  %v575_v37 = vld [vmem:[%s1417_s3 + $0x10] sm:$0xff] (!%p806_p7)  ;;  %v576_v38 = vld [vmem:[%s1417_s3 + $0x18] sm:$0xff] (!%p806_p7) }
 0x132   : > { %v518_v46 = vadd.f32 %v517_v44, %v290_v27  ;;  %v397_v47 = vadd.f32 %v396_v45, %v290_v27  ;;  %v398_v48 = vpop.f32.mrb[5].mxu0  ;;  %v519_v49 = vpop.f32.mrb[5].mxu1  ;;  %828 = vmatprep.subr.bf16.mxu0 (!%p806_p7), %v1108_v32  ;;  %v1110_v39 = vmov (!%p806_p7), 0.0   ;;  %v684_v45 = vld [vmem:[%s1418_s4] sm:$0x1] (!%p806_p7) }
 0x133   : > { %v399_v50 = vadd.f32 %v398_v48, %v290_v27  ;;  %v520_v51 = vadd.f32 %v519_v49, %v290_v27  ;;  %v418_v52 = vadd.f32 %v410_v42, %v409_v40  ;;  %v539_v53 = vadd.f32 %v531_v43, %v530_v41  ;;  %v555_v27 = vld [vmem:[#allocation2 + $0x18] sm:$0xff]  ;;  %825 = vmatprep.mubr.msk.f32.mxu0 (!%p806_p7), %vm1109_vm4, %v1110_v39 }
 0x134   : > { %v532_v54 = vmax.f32 %v518_v46, 0.0  ;;  %v411_v55 = vmax.f32 %v397_v47, 0.0  ;;  %830 = vmatpush3.bf16.msra.mxu0 (!%p806_p7), %v829_v36  ;;  %v832_v40 = vpack.c.bf16 (!%p806_p7), %v576_v38, %v575_v37 }
 0x135   : > { %v412_v57 = vmax.f32 %v399_v50, 0.0  ;;  %v533_v58 = vmax.f32 %v520_v51, 0.0  ;;  %v402_v59 = vpop.f32.mrb[6].mxu0  ;;  %v523_v60 = vpop.f32.mrb[6].mxu1  ;;  %419 = vadd.xlane.f32.xlu1 %v418_v52  ;;  %540 = vadd.xlane.f32.xlu0 %v539_v53 }
 0x136   : > { %v403_v61 = vadd.f32 %v402_v59, %v295_v56  ;;  %v524_v62 = vadd.f32 %v523_v60, %v295_v56  ;;  %v404_v63 = vpop.f32.mrb[7].mxu0  ;;  %v525_v0 = vpop.f32.mrb[7].mxu1  ;;  %831 = vmatprep.subr.bf16.mxu0 (!%p806_p7), %v1108_v32 }
 0x137   : > { %v405_v1 = vadd.f32 %v404_v63, %v295_v56  ;;  %v526_v2 = vadd.f32 %v525_v0, %v295_v56  ;;  %v542_v3 = vadd.f32 %v533_v58, %v532_v54  ;;  %v421_v4 = vadd.f32 %v412_v57, %v411_v55 }
 0x138   : > { %v413_v5 = vmax.f32 %v403_v61, 0.0  ;;  %v534_v6 = vmax.f32 %v524_v62, 0.0  ;;  %833 = vmatpush3.bf16.msra.mxu0 (!%p806_p7), %v832_v40 }
 0x139   : > { %v414_v7 = vmax.f32 %v405_v1, 0.0  ;;  %v535_v8 = vmax.f32 %v526_v2, 0.0  ;;  %543 = vadd.xlane.f32.xlu1 %v542_v3  ;;  %422 = vadd.xlane.f32.xlu0 %v421_v4 }
 0x13b   : > { %v424_v9 = vadd.f32 %v414_v7, %v413_v5  ;;  %v545_v10 = vadd.f32 %v535_v8, %v534_v6 }
 0x13d   : > { %425 = vadd.xlane.f32.xlu0 %v424_v9 }
 0x141   : > { %546 = vadd.xlane.f32.xlu0 %v545_v10 }
 0x1be   : > { %v538_v11 = vpop.xlane.xlu1 %537  ;;  %v417_v13 = vpop.xlane.xlu0 %416 }
 0x1bf   : > { %v548_v14 = vadd.f32 %v538_v11, %v417_v13 }
 0x1c1   : > { %v556_v15 = vadd.f32 %v552_v12, %v548_v14 }
 0x1c2   : > { %v420_v16 = vpop.xlane.xlu1 %419  ;;  %v541_v18 = vpop.xlane.xlu0 %540 }
 0x1c3   : > { %561 = vst.msk [vmem:[#allocation2] sm:$0xff] %vm560_vm3, %v556_v15  ;;  %v549_v19 = vadd.f32 %v541_v18, %v420_v16 }
 0x1c5   : > { %v557_v20 = vadd.f32 %v553_v17, %v549_v19 }
 0x1c6   : > { %v544_v21 = vpop.xlane.xlu1 %543  ;;  %v423_v23 = vpop.xlane.xlu0 %422 }
 0x1c7   : > { %562 = vst.msk [vmem:[#allocation2 + $0x8] sm:$0xff] %vm560_vm3, %v557_v20  ;;  %v550_v24 = vadd.f32 %v544_v21, %v423_v23 }
 0x1c9   : > { %v558_v25 = vadd.f32 %v554_v22, %v550_v24 }
 0x1ca   : > { %v426_v26 = vpop.xlane.xlu0 %425  ;;  %v569_v31 = vld [vmem:[#allocation2] sm:$0xff] (!%p806_p7) }
 0x1cb   : > { %563 = vst.msk [vmem:[#allocation2 + $0x10] sm:$0xff] %vm560_vm3, %v558_v25  ;;  %577 = vxpose.xlu0.b32.start [1/4] (short) (narrow) (!%p806_p7), %v569_v31, 8 }
 0x1cd   : > { %568 = sbr.rel (%p806_p7) target bundleno = 809 (0x329), region = 52 }
 0x1ce   : > { %v547_v28 = vpop.xlane.xlu0 %546  ;;  %v570_v35 = vld [vmem:[#allocation2 + $0x8] sm:$0xff] (!%p806_p7) }
 0x1cf   : > { %v551_v29 = vadd.f32 %v547_v28, %v426_v26  ;;  %578 = vxpose.xlu0.b32.cont [2/4] (short) (narrow) (!%p806_p7), %v570_v35, 8 }
 0x1d1   : > { %v559_v30 = vadd.f32 %v555_v27, %v551_v29 }
 0x1d2   : > { %v571_v41 = vld [vmem:[#allocation2 + $0x10] sm:$0xff] (!%p806_p7) }
 0x1d3   : > { %564 = vst.msk [vmem:[#allocation2 + $0x18] sm:$0xff] %vm560_vm3, %v559_v30  ;;  %579 = vxpose.xlu0.b32.cont [3/4] (short) (narrow) (!%p806_p7), %v571_v41, 8 }
 0x1da   : > { %v572_v42 = vld [vmem:[#allocation2 + $0x18] sm:$0xff] }
 0x1db   : > { %580 = vxpose.xlu0.b32.end [4/4] (short) (narrow) %v572_v42, 8 }
 0x24f   : > { %v593_v43 = vpop.trf.xlu0 }
 0x250   : > { %826 = vmatmul.mubr.msk.f32.vlgmr.msra.gmra.mrb[0].mxu0 %vm609_vm5, %v593_v43 }
 0x323   : > { %v679_v44 = vpop.f32.mrb[0].mxu0 }
 0x324   : > { %v683_v46 = vmul.f32 0.00048828125, %v679_v44  ;;  %v827_v47 = vpop.f32.mrb[1].mxu0 }
 0x326   : > { %v685_v48 = vadd.f32 %v684_v45, %v683_v46 }
 0x328   : > { %687 = vst.msk [vmem:[%s1295_s23] sm:$0x1] %vm686_vm6, %v685_v48 }
 0x329 PF: > { %s808_s12 = sshll.u32 %s1088_s25, 4  ;;  %s1435_s30 = sld [smem:[#allocation13_spill]] }
 0x32a   : > { %s701_s9 = sshll.u32 %s1295_s23, 4  ;;  %s689_s10 = scalar_lea.sflag [#allocation5], %s257_s11  ;;  %s702_s9 = int_to_ptr.vmem [resolvable:$true] %s701_s9 }
 0x32b   : > { %s978_s17 = scalar_lea.vmem %s702_s9, 16  ;;  %p1436_p4 = scmp.ne.s32.totalorder %s1431_s15, 0 }
 0x32c   : > { %p979_p2 = scmp.ne.s32.totalorder %s702_s9, %s978_s17  ;;  %s1111_s13 = smov [#allocation6]  }
 0x32d   : > { %s982_s24 = sshll.u32 %s1111_s13, 4  ;;  %s983_s24 = int_to_ptr.vmem [resolvable:$false] %s982_s24 }
 0x32e   : > { %p980_p0 = pnand %p979_p2, %p1436_p4  ;;  %s984_s14 = scalar_lea.vmem %s983_s24, 32 }
 0x32f   : > { %s1355_s5 = scalar_lea.hbm %s1435_s30, %s808_s12  ;;  %p985_p5 = scmp.lt.s32.totalorder %s702_s9, %s983_s24 }
 0x330   : > { %p981_p1 = pneg %p980_p0  ;;  %p986_p6 = scmp.lt.s32.totalorder %s984_s14, %s978_s17 }
 0x332   : > { %p987_p9 = por %p986_p6, %p985_p5 }
 0x334   : > { %p988_p10 = pnand %p987_p9, %p981_p1 }
 0x336   : > { %991 = shalt.err (!%p988_p10)
}
 0x337   : > { %s992_s25 = scalar_lea.hbm %s1355_s5, 16  ;;  %s996_s29 = scalar_lea.hbm %s1435_s30, 32 }
 0x338   : > { %p993_p11 = scmp.ne.s32.totalorder %s1355_s5, %s992_s25  ;;  %p997_p13 = scmp.lt.u32.totalorder %s1355_s5, %s1435_s30 }
 0x339   : > { %p998_p12 = scmp.lt.u32.totalorder %s996_s29, %s992_s25  ;;  %p1000_p2 = scmp.lt.u32.totalorder %s992_s25, %s1355_s5 }
 0x33a   : > { %p994_p3 = pnand %p993_p11, %p1436_p4 }
 0x33b   : > { %p999_p7 = por %p998_p12, %p997_p13 }
 0x33c   : > { %p995_p8 = pneg %p994_p3 }
 0x33d   : > { %p1001_p0 = por %p1000_p2, %p999_p7 }
 0x33f   : > { %p1002_p1 = pnand %p1001_p0, %p995_p8 }
 0x341   : > { %1005 = shalt.err (!%p1002_p1)
}
 0x342   : > { %836 = dma.vmem_to_hbm [thread:$0]  (%p1436_p4), %s702_s9, 16, %s1355_s5, %s689_s10  }
 0x343 PF: > { %p847_p5 = scmp.ge.s32.totalorder %s1100_s28, 2  ;;  %s713_s8 = sand.u32 1, %s1060_s18  }
 0x344   : > { %p1437_p6 = scmp.ne.s32.totalorder %s1433_s21, 0  ;;  %s714_s7 = scalar_lea.sflag [#allocation5], %s713_s8 }
 0x346   : > { %p843_p9 = pnand %p847_p5, %p1437_p6 }
 0x348   : > { %1055 = dma.done.wait (!%p843_p9), %s714_s7, 16  }
 0x349   : > { %1057 = vsyncadd (!%p843_p9), %s714_s7, 4294967280  ;;  %s21_s28 = sadd.s32 1, %s1100_s28   ;;  %s1438_s15 = sld [smem:[#allocation9_spill]] }
 0x34a   : > { %p18_p10 = scmp.ge.s32.totalorder %s21_s28, 10   ;;  %s1439_s23 = sld [smem:[#allocation12_spill]] }
 0x34b   : > { %s1440_s5 = sld [smem:[#allocation10_spill]]  ;;  %s1441_s9 = sld [smem:[#allocation11_spill]] }
 0x34c   : > { %s1442_s18 = smov %s1064_s19  ;;  %s1443_s19 = smov %s1068_s20 }
 0x34d   : > { %s1444_s20 = smov %s1229_s16  ;;  %s1445_s21 = smov %s1076_s22 }
 0x34e   : > { %s1447_s24 = smov %s1092_s26  ;;  %s1448_s25 = smov %s1096_s27 }
 0x34f   : > { %s1446_s22 = smov %s1438_s15  ;;  %20 = sbr.rel (!%p18_p10) target bundleno = 11 (0xb), region = 94 }
 0x351   : > { %s1449_s26 = smov %s1440_s5  ;;  %s1450_s27 = smov %s1441_s9 }
 0x356   :  { %718 = vsyncpa [#allocation4], 1 }
 0x357   :  { %720 = vsyncpa [#allocation4 + $0x1], 1 }
 0x358   :  { %721 = vsyncpa [#allocation5], 1 }
 0x359   :  { %723 = vsyncpa [#allocation5 + $0x1], 1 }

</bundles_post_ra>
